<compile_context>
chip_gen: v6e
topology: v6e:2x2x1
jax: 0.10.0
libtpu: 0.0.40
codegen_flags: <defaults>
</compile_context>

<pallas_src>
import functools

import jax
import jax.numpy as jnp
from jax.experimental import pallas as pl
from jax.experimental.pallas import tpu as pltpu


def _rope_kernel(theta_ref, pos_ref, x_ref, o_ref, *, offset, max_seq_len):
    # theta_ref: (1, D)  f32, signed & pair-expanded: [-t0, +t0, -t1, +t1, ...]
    # pos_ref:   (TR, 1) i32
    # x_ref:     (TR, D) x.dtype, interleaved RoPE pairs along lanes
    # o_ref:     (TR, D) x.dtype
    pos = pos_ref[...] + offset
    pos = jnp.clip(pos, 0, max_seq_len - 1).astype(jnp.float32)      # (TR, 1)

    th = theta_ref[...]                                              # (1, D) signed
    ang = pos * th                                                    # (TR, D)
    c = jnp.cos(ang)                 # cos is even -> sign in theta is a no-op here
    s = jnp.sin(ang)                 # sign already baked in: -sin on even lanes

    # Lane parity from the resident theta sign (even lanes carry -t < 0).
    even = th < 0.0                                                   # (1, D) bool

    D = x_ref.shape[-1]
    x = x_ref[...].astype(jnp.float32)
    # Pair swap on the XLU (cheap, off the VALU critical path):
    #   swapped[..., 2i]   = x[..., 2i+1]
    #   swapped[..., 2i+1] = x[..., 2i]
    x_swap = jnp.where(even,
                       pltpu.roll(x, shift=D - 1, axis=1),   # neighbor at +1
                       pltpu.roll(x, shift=1, axis=1))       # neighbor at -1

    # out[2i]   = x[2i]*cos_i   - x[2i+1]*sin_i
    # out[2i+1] = x[2i+1]*cos_i + x[2i]  *sin_i
    o_ref[...] = (x * c + x_swap * s).astype(o_ref.dtype)


def _pick_row_tile(total_rows, D, itemsize):
    """Generation-aware row-tile + VMEM limit."""
    vmem_bytes = 64 * 1024 * 1024          # conservative default (v7x per-TC)
    try:
        info = pltpu.get_tpu_info()
        vmem_bytes = getattr(info, "vmem_capacity_bytes", vmem_bytes)
    except Exception:
        pass

    if vmem_bytes >= 100 * 1024 * 1024:    # v5e / v6e: 128 MiB VMEM
        target_block_bytes = 8 * 1024 * 1024
        vmem_limit = 100 * 1024 * 1024
    else:                                  # v7x: 64 MiB VMEM per TensorCore
        target_block_bytes = 2 * 1024 * 1024
        vmem_limit = 32 * 1024 * 1024

    rows = target_block_bytes // max(1, D * itemsize)
    rows = max(8, min(rows, 16384))
    rows = (rows // 8) * 8

    # Guarantee >= 2 parallel grid steps whenever the problem allows it, so
    # both v7x TensorCores get work even for B == 1.
    if total_rows >= 16:
        half = max(8, (pl.cdiv(total_rows, 2) // 8) * 8)
        rows = min(rows, half)

    rows = min(rows, total_rows)
    return rows, vmem_limit


def rotary_positional_embeddings(x, positions, *, dim, max_seq_len=4096,
                                 base=10000, offset=0, row_tile=None):
    """Apply RoPE. x: [B, S, dim], positions: [B, S] int. Returns x-shaped/dtyped array."""
    assert dim % 2 == 0, "RoPE dim must be divisible by 2"
    B, S, D = x.shape
    assert D == dim
    D2 = D // 2

    # theta exactly as the PyTorch rope_init, then signed & pair-expanded to D
    # lanes: [-t0, +t0, -t1, +t1, ...]  (tiny, one-time).
    theta = 1.0 / (base ** (jnp.arange(0, dim, 2, dtype=jnp.float32)[:D2] / dim))
    sign = jnp.tile(jnp.array([-1.0, 1.0], dtype=jnp.float32), D2)
    theta_signed = (jnp.repeat(theta, 2) * sign).reshape(1, D)

    # Flatten (B, S) -> one row axis: lane layout of the last dim is unchanged.
    R = B * S
    x2 = x.reshape(R, D)
    pos2 = positions.astype(jnp.int32).reshape(R, 1)

    itemsize = jnp.dtype(x.dtype).itemsize
    if row_tile is None:
        row_tile, vmem_limit = _pick_row_tile(R, D, itemsize)
    else:
        _, vmem_limit = _pick_row_tile(R, D, itemsize)
        row_tile = min(row_tile, R)
    if row_tile < R:
        assert row_tile % 8 == 0, "row_tile must be a multiple of 8 when tiling rows"

    grid = (pl.cdiv(R, row_tile),)

    kernel = functools.partial(_rope_kernel, offset=offset, max_seq_len=max_seq_len)

    cost = pl.CostEstimate(
        flops=6 * R * D,
        transcendentals=2 * R * D,
        bytes_accessed=2 * R * D * itemsize + R * 4 + D * 4,
    )

    out = pl.pallas_call(
        kernel,
        out_shape=jax.ShapeDtypeStruct((R, D), x.dtype),
        grid_spec=pltpu.PrefetchScalarGridSpec(
            num_scalar_prefetch=0,
            grid=grid,
            in_specs=[
                pl.BlockSpec((1, D), lambda i: (0, 0)),             # theta (resident)
                pl.BlockSpec((row_tile, 1), lambda i: (i, 0)),      # positions
                pl.BlockSpec((row_tile, D), lambda i: (i, 0)),      # x (interleaved)
            ],
            out_specs=pl.BlockSpec((row_tile, D), lambda i: (i, 0)),
        ),
        compiler_params=pltpu.CompilerParams(
            dimension_semantics=("parallel",),
            vmem_limit_bytes=vmem_limit),
        cost_estimate=cost,
    )(theta_signed, pos2, x2)
    return out.reshape(B, S, D)


def _reference(x, positions, *, dim, max_seq_len, base, offset):
    """Pure-JAX reference mirroring the PyTorch forward."""
    D2 = dim // 2
    theta = 1.0 / (base ** (jnp.arange(0, dim, 2, dtype=jnp.float32)[:D2] / dim))
    seq_idx = jnp.arange(max_seq_len, dtype=jnp.float32)
    idx_theta = jnp.einsum("i,j->ij", seq_idx, theta)
    cache = jnp.stack([jnp.cos(idx_theta), jnp.sin(idx_theta)], axis=-1)  # (L, D/2, 2)

    p = jnp.clip(positions + offset, 0, max_seq_len - 1)
    rc = cache[p]                                                   # (B, S, D/2, 2)
    B, S = p.shape
    xr = x.astype(jnp.float32).reshape(B, S, -1, 2)
    out = jnp.stack(
        [xr[..., 0] * rc[..., 0] - xr[..., 1] * rc[..., 1],
         xr[..., 1] * rc[..., 0] + xr[..., 0] * rc[..., 1]], axis=-1)
    return out.reshape(B, S, dim).astype(x.dtype)


if __name__ == "__main__":
    BASE = 10000
    MAX_SEQ_LEN = 64
    OFFSET = 4

    key = jax.random.PRNGKey(0)
    k1, k2, k3, k4 = jax.random.split(key, 4)

    # Case 1: small shape consistent with the module (B=2, S=8, dim=32).
    B, S, D = 2, 8, 32
    x = jax.random.normal(k1, (B, S, D), dtype=jnp.float32)
    # Include negative / out-of-range positions to exercise offset + clamp.
    positions = jax.random.randint(k2, (B, S), -6, MAX_SEQ_LEN + 4, dtype=jnp.int32)

    out = rotary_positional_embeddings(
        x, positions, dim=D, max_seq_len=MAX_SEQ_LEN, base=BASE, offset=OFFSET)
    out = jax.block_until_ready(out)
    ref = _reference(x, positions, dim=D, max_seq_len=MAX_SEQ_LEN,
                     base=BASE, offset=OFFSET)
    assert out.shape == (B, S, D) and out.dtype == x.dtype
    assert jnp.allclose(out, ref, atol=1e-5, rtol=1e-5), "case1 mismatch vs reference"

    # Case 2: exercise the row-tile grid axis (grid = (B*S / row_tile,)).
    B2, S2 = 2, 64
    x2 = jax.random.normal(k3, (B2, S2, D), dtype=jnp.float32)
    positions2 = jax.random.randint(k4, (B2, S2), -6, MAX_SEQ_LEN + 4, dtype=jnp.int32)
    out2 = rotary_positional_embeddings(
        x2, positions2, dim=D, max_seq_len=MAX_SEQ_LEN, base=BASE, offset=OFFSET,
        row_tile=16)
    out2 = jax.block_until_ready(out2)
    ref2 = _reference(x2, positions2, dim=D, max_seq_len=MAX_SEQ_LEN,
                      base=BASE, offset=OFFSET)
    assert jnp.allclose(out2, ref2, atol=1e-5, rtol=1e-5), "case2 mismatch vs reference"

    print("KERNEL_OK")
</pallas_src>

<mosaic_0001>
module attributes {stable_mosaic.version = 11 : i64} {
  func.func @_rope_kernel(%arg0: i32, %arg1: memref<1x32xf32, #tpu.memory_space<vmem>>, %arg2: memref<8x1xi32, #tpu.memory_space<vmem>>, %arg3: memref<8x32xf32, #tpu.memory_space<vmem>>, %arg4: memref<8x32xf32, #tpu.memory_space<vmem>>) attributes {dimension_semantics = [#tpu.dimension_semantics<parallel>], iteration_bounds = array<i64: 2>, scalar_prefetch = 0 : i64, scratch_operands = 0 : i64, tpu.core_type = #tpu.core_type<tc>, window_params = [{pipeline_mode = #tpu.pipeline_mode<synchronous>, transform_indices = @transform_0, window_bounds = array<i64: 1, 32>}, {transform_indices = @transform_1, window_bounds = array<i64: 8, 1>}, {transform_indices = @transform_2, window_bounds = array<i64: 8, 32>}, {transform_indices = @transform_3, window_bounds = array<i64: 8, 32>}]} {
    %c0 = arith.constant 0 : index
    %c0_0 = arith.constant 0 : index
    %0 = vector.load %arg2[%c0, %c0_0] : memref<8x1xi32, #tpu.memory_space<vmem>>, vector<8x1xi32>
    %c4_i32 = arith.constant 4 : i32
    %1 = vector.broadcast %c4_i32 : i32 to vector<8x1xi32>
    %2 = arith.addi %0, %1 : vector<8x1xi32>
    %c0_i32 = arith.constant 0 : i32
    %c63_i32 = arith.constant 63 : i32
    %3 = vector.broadcast %c0_i32 : i32 to vector<8x1xi32>
    %4 = arith.maxsi %3, %2 : vector<8x1xi32>
    %5 = vector.broadcast %c63_i32 : i32 to vector<8x1xi32>
    %6 = arith.minsi %5, %4 : vector<8x1xi32>
    %7 = arith.sitofp %6 : vector<8x1xi32> to vector<8x1xf32>
    %c0_1 = arith.constant 0 : index
    %c0_2 = arith.constant 0 : index
    %8 = vector.load %arg1[%c0_1, %c0_2] : memref<1x32xf32, #tpu.memory_space<vmem>>, vector<1x32xf32>
    %9 = vector.broadcast %7 : vector<8x1xf32> to vector<8x32xf32>
    %10 = vector.broadcast %8 : vector<1x32xf32> to vector<8x32xf32>
    %11 = arith.mulf %9, %10 : vector<8x32xf32>
    %12 = math.cos %11 : vector<8x32xf32>
    %13 = math.sin %11 : vector<8x32xf32>
    %cst = arith.constant 0.000000e+00 : f32
    %14 = vector.broadcast %cst : f32 to vector<1x32xf32>
    %15 = arith.cmpf olt, %8, %14 : vector<1x32xf32>
    %c0_3 = arith.constant 0 : index
    %c0_4 = arith.constant 0 : index
    %16 = vector.load %arg3[%c0_3, %c0_4] : memref<8x32xf32, #tpu.memory_space<vmem>>, vector<8x32xf32>
    %c31_i32 = arith.constant 31 : i32
    %17 = tpu.dynamic_rotate %16 by %c31_i32 dim 1 : vector<8x32xf32>, i32 -> vector<8x32xf32>
    %c1_i32 = arith.constant 1 : i32
    %18 = tpu.dynamic_rotate %16 by %c1_i32 dim 1 : vector<8x32xf32>, i32 -> vector<8x32xf32>
    %19 = vector.shape_cast %15 : vector<1x32xi1> to vector<1x32xi1>
    %20 = vector.broadcast %19 : vector<1x32xi1> to vector<8x32xi1>
    %21 = arith.select %20, %17, %18 : vector<8x32xi1>, vector<8x32xf32>
    %22 = arith.mulf %16, %12 : vector<8x32xf32>
    %23 = arith.mulf %21, %13 : vector<8x32xf32>
    %24 = arith.addf %22, %23 : vector<8x32xf32>
    %c0_5 = arith.constant 0 : index
    %c0_6 = arith.constant 0 : index
    %25 = vector.load %arg4[%c0_5, %c0_6] : memref<8x32xf32, #tpu.memory_space<vmem>>, vector<8x32xf32>
    tpu.vector_store %arg4[%c0_5, %c0_6], %24 {strides = array<i32>} : memref<8x32xf32, #tpu.memory_space<vmem>>, vector<8x32xf32>,
    return
  }
  func.func @transform_0(%arg0: i32) -> (i32, i32) {
    %c0_i32 = arith.constant 0 : i32
    %c0_i32_0 = arith.constant 0 : i32
    %c0_i32_1 = arith.constant 0 : i32
    return %c0_i32, %c0_i32_0 : i32, i32
  }
  func.func @transform_1(%arg0: i32) -> (i32, i32) {
    %c0_i32 = arith.constant 0 : i32
    %c0_i32_0 = arith.constant 0 : i32
    return %arg0, %c0_i32 : i32, i32
  }
  func.func @transform_2(%arg0: i32) -> (i32, i32) {
    %c0_i32 = arith.constant 0 : i32
    %c0_i32_0 = arith.constant 0 : i32
    return %arg0, %c0_i32 : i32, i32
  }
  func.func @transform_3(%arg0: i32) -> (i32, i32) {
    %c0_i32 = arith.constant 0 : i32
    %c0_i32_0 = arith.constant 0 : i32
    return %arg0, %c0_i32 : i32, i32
  }
}

</mosaic_0001>

<bundles_post_ra>
// kernel: tpu_custom_call.1
= control target key start
LH: loop header
LB: loop body
LE: loop exit
PB: predicated region body
PF: predicated region fallthrough
CT: control target
= control target key end

     0   :  { %8 = vsyncpa [#allocation3], 0  ;;  %s830_s0 = inlined_call_operand.vmem [shape: f32[1,32], index: 0, kind: input, shape index: {}]   ;;  %s831_s1 = inlined_call_operand.vmem [shape: s32[16,1], index: 1, kind: input, shape index: {}]   ;;  %s832_s2 = inlined_call_operand.vmem [shape: f32[16,32], index: 2, kind: input, shape index: {}]   ;;  %s833_s3 = inlined_call_operand.hbm [shape: f32[16,32], index: 3, kind: output, shape index: {}]  }
   0x1   :  { %10 = vsyncpa [#allocation3 + $0x1], 0  ;;  %s693_s12 = smov 0   ;;  %s695_s13 = smov 0  }
   0x2   :  { %s697_s14 = smov 0   ;;  %s699_s15 = smov 0  }
   0x3 LB: > { %s714_s16 = sadd.s32 4294967295, %s660_s15   ;;  %s523_s17 = sadd.s32 4294967294, %s660_s15   ;;  %s660_s15 = sphi %s699_s15, %s839_s15   ;;  %s656_s14 = sphi %s697_s14, %s838_s14   ;;  %s652_s13 = sphi %s695_s13, %s837_s13   ;;  %s648_s12 = sphi %s693_s12, %s836_s12  }
   0x4   : > { %s718_s18 = sadd.s32 1, %s660_s15   ;;  %s96_s19 = sadd.s32 1, %s656_s14 }
   0x5   : > { %s93_s20 = ssub.s32 %s660_s15, %s718_s18  ;;  %p106_p0 = scmp.ne.s32.totalorder %s656_s14, %s652_s13 }
   0x6   : > { %p94_p1 = scmp.eq.s32.totalorder %s93_s20, 0  ;;  %p107_p2 = scmp.eq.s32.totalorder %s714_s16, 1 }
   0x7   : > { %p112_p3 = scmp.ne.s32.totalorder %s652_s13, %s648_s12  ;;  %p113_p4 = scmp.eq.s32.totalorder %s523_s17, 1 }
   0x8   : > { %s729_s21 = scalar_select %p94_p1, %s656_s14, %s96_s19  }
   0x9   : > { %p731_p5 = por %p107_p2, %p106_p0  ;;  %p735_p6 = por %p113_p4, %p112_p3 }
   0xa   : > { %p526_p7 = scmp.ge.s32.totalorder %s660_s15, 1  ;;  %p148_p8 = scmp.lt.s32.totalorder %s660_s15, 3 }
   0xc   : > { %p149_p9 = pnand %p526_p7, %p148_p8 }
   0xd   : > { %p175_p10 = scmp.lt.s32.totalorder (!%p149_p9), %s714_s16, 1  ;;  %s663_s7 = smov (!%p149_p9), 32  }
   0xe   : > { %152 = sbr.rel (%p149_p9) target bundleno = 393 (0x189), region = 32  ;;  %s670_s8 = smov (!%p149_p9), 127  }
   0xf   : > { %s671_s9 = smov (!%p149_p9), 97   ;;  %s172_s10 = sand.u32 (!%p149_p9), 1, %s652_s13  }
  0x10   : > { %s527_s11 = sshll.u32 (!%p149_p9), %s172_s10, 3  ;;  %s539_s17 = sshll.u32 (!%p149_p9), %s714_s16, 7 }
  0x11   : > { %s174_s19 = scalar_lea.vmem (!%p149_p9), [#allocation2], %s527_s11 }
  0x12   : > { %s452_s20 = sshll.u32 (!%p149_p9), %s174_s19, 4  ;;  %s453_s20 = int_to_ptr.vmem [resolvable:$true] %s452_s20 }
  0x13   : > { %v197_v0 = vlaneseq  ;;  %v190_v1 = vld [vmem:[%s830_s0] sm:$0x1]  ;;  %v662_v2 = vmov 0   ;;  %s176_s26 = scalar_select %p175_p10, %s714_s16, 1  ;;  %vm412_vm3 = vcmask 1047808  }
  0x14   : > { %595 = vset.pattern.permute.xlu0 %v662_v2  ;;  %vm410_vm0 = vcmp.lt.f32.partialorder %v190_v1, 0.0  ;;  %v664_v25 = vmov 2102212464   ;;  %v665_v27 = vmov 920167782   ;;  %s600_s28 = scalar_lea.vmem %s453_s20, 128 }
  0x15   : > { %v198_v3 = vshrl.u32 %v197_v0, 7  ;;  %v419_v4 = vsel %vm410_vm0, 1, %v662_v2  ;;  %s528_s27 = sshll.u32 %s176_s26, 3  ;;  %v666_v32 = vmov 1326507024   ;;  %s450_s26 = scalar_lea.hbm %s833_s3, %s539_s17 }
  0x16   : > { %s182_s30 = scalar_lea.vmem %s832_s2, %s528_s27  ;;  %s178_s6 = scalar_lea.vmem %s831_s1, %s528_s27  ;;  %v667_v34 = vmov 683565275   ;;  %v668_v36 = vmov 2475754826   ;;  %v669_v39 = vmov 2131351028  }
  0x17   : > { %v199_v5 = vsub.s32 0, %v198_v3  ;;  %v752_v6 = vld [vmem:[%s182_s30] sm:$0xff]  ;;  %s439_s27 = scalar_lea.sflag [#allocation3], %s172_s10  ;;  %p601_p11 = scmp.ne.s32.totalorder %s453_s20, %s600_s28 }
  0x18   : > { %v183_v7 = vld [vmem:[%s178_s6] sm:$0xff]  ;;  %413 = vrot.lane.b32.xlu0 %v752_v6, %s663_s7  ;;  %s672_s16 = smov [#allocation2]  }
  0x19   : > { %v754_v8 = vrot.slane %v419_v4, %v199_v5  ;;  %v184_v9 = vadd.s32 4, %v183_v7  ;;  %v200_v15 = vrot.slane %v190_v1, %v199_v5  ;;  %p602_p12 = pnand %p601_p11, %p731_p5  ;;  %s604_s29 = sshll.u32 %s672_s16, 4  ;;  %s605_s29 = int_to_ptr.vmem [resolvable:$false] %s604_s29 }
  0x1a   : > { %s606_s30 = scalar_lea.vmem %s605_s29, 256  ;;  %p607_p0 = scmp.lt.s32.totalorder %s453_s20, %s605_s29 }
  0x1b   : > { %vm185_vm1 = vcmp.gt.s32.totalorder %v184_v9, 0  ;;  %p603_p13 = pneg %p602_p12  ;;  %p608_p1 = scmp.lt.s32.totalorder %s606_s30, %s600_s28 }
  0x1c   : > { %v186_v10 = vsel %vm185_vm1, %v184_v9, 0 }
  0x1d   : > { %vm187_vm2 = vcmp.lt.s32.totalorder %v186_v10, 63  ;;  %p609_p2 = por %p608_p1, %p607_p0 }
  0x1e   : > { %v188_v11 = vsel %vm187_vm2, %v186_v10, 63 }
  0x1f   : > { %v189_v12 = vcvt.s32.f32 %v188_v11  ;;  %p610_p3 = pnand %p609_p2, %p603_p13 }
  0x21   : > { %193 = vperm.xlu0 %595, %v189_v12  }
  0x8a   : > { %v414_v13 = vpop.permute.xlu0 %413 }
  0x8b   : > { %v415_v14 = vsel %vm412_vm3, %v414_v13, %v752_v6 }
  0x8c   : > { %416 = vrot.lane.b32.xlu1 %v415_v14, %s663_s7 }
  0x9c   : > { %v194_v16 = vpop.permute.xlu0 %193 }
  0x9d   : > { %v759_v17 = vmul.f32 %v200_v15, %v194_v16 }
  0x9f   : > { %v206_v18 = vand.u32 2139095040, %v759_v17  ;;  %v203_v29 = vand.u32 2147483647, %v759_v17  ;;  %vm205_vm11 = vcmp.lt.s32.totalorder %v759_v17, 0 }
  0xa1   : > { %v207_v19 = vshrl.u32 %v206_v18, 23  ;;  %v210_v44 = vand.u32 8388607, %v203_v29  ;;  %vm204_vm12 = vcmp.le.f32.partialorder %v203_v29, 0.7853982 }
  0xa3   : > { %v530_v20 = vadd.s32 4294967169, %v207_v19  ;;  %v211_v50 = vor.u32 8388608, %v210_v44 }
  0xa5   : > { %v213_v21 = vadd.s32 1, %v530_v20  ;;  %v251_v56 = vshll.u32 %v211_v50, 8 }
  0xa7   : > { %vm214_vm4 = vcmp.gt.s32.totalorder %v213_v21, 0 }
  0xa8   : > { %v215_v22 = vsel %vm214_vm4, %v213_v21, 0  ;;  %vm424_vm4 = vcmp.eq.s32.totalorder %v754_v8, 1 }
  0xa9   : > { %v217_v23 = vand.u32 31, %v215_v22  ;;  %v216_v30 = vshrl.u32 %v215_v22, 5 }
  0xab   : > { %v218_v24 = vsub.s32 32, %v217_v23  ;;  %v229_v26 = vshll.u32 %v664_v25, %v217_v23  ;;  %v232_v31 = vshll.u32 %v665_v27, %v217_v23  ;;  %v220_v35 = vshll.u32 %v667_v34, %v217_v23 }
  0xac   : > { %v223_v37 = vshll.u32 %v668_v36, %v217_v23  ;;  %v226_v41 = vshll.u32 %v669_v39, %v217_v23  ;;  %vm238_vm5 = vcmp.lt.s32.totalorder %v216_v30, 4  ;;  %vm235_vm6 = vcmp.lt.s32.totalorder %v216_v30, 1 }
  0xad   : > { %v230_v28 = vshrl.u32 %v665_v27, %v218_v24  ;;  %v233_v33 = vshrl.u32 %v666_v32, %v218_v24  ;;  %v221_v38 = vshrl.u32 %v668_v36, %v218_v24  ;;  %v224_v40 = vshrl.u32 %v669_v39, %v218_v24 }
  0xae   : > { %v227_v42 = vshrl.u32 %v664_v25, %v218_v24  ;;  %vm237_vm7 = vcmp.lt.s32.totalorder %v216_v30, 3  ;;  %vm236_vm8 = vcmp.lt.s32.totalorder %v216_v30, 2  ;;  %v219_v63 = vshrl.u32 %v667_v34, %v218_v24 }
  0xaf   : > { %v231_v43 = vor.u32 %v230_v28, %v229_v26  ;;  %v234_v45 = vor.u32 %v233_v33, %v232_v31  ;;  %v222_v46 = vor.u32 %v221_v38, %v220_v35  ;;  %v225_v47 = vor.u32 %v224_v40, %v223_v37 }
  0xb0   : > { %v228_v48 = vor.u32 %v227_v42, %v226_v41 }
  0xb1   : > { %v244_v49 = vsel %vm238_vm5, %v231_v43, 920167782  ;;  %v248_v51 = vsel %vm238_vm5, %v234_v45, 1326507024  ;;  %v243_v52 = vsel %vm235_vm6, %v222_v46, %v225_v47  ;;  %v239_v3 = vsel %vm235_vm6, %v219_v63, %v222_v46 }
  0xb2   : > { %v245_v53 = vsel %vm237_vm7, %v228_v48, %v244_v49  ;;  %v247_v54 = vsel %vm235_vm6, %v225_v47, %v228_v48  ;;  %v249_v55 = vsel %vm237_vm7, %v231_v43, %v248_v51  ;;  %v240_v2 = vsel %vm238_vm5, %v228_v48, 2102212464 }
  0xb3   : > { %v246_v57 = vsel %vm236_vm8, %v243_v52, %v245_v53  ;;  %v250_v58 = vsel %vm236_vm8, %v247_v54, %v249_v55  ;;  %v241_v4 = vsel %vm237_vm7, %v225_v47, %v240_v2  ;;  %vm436_vm5 = vcmask 261120  }
  0xb4   : > { %v773_v60 = vmul.u32.u64.low %v251_v56, %v246_v57  ;;  %v774_v61 = vmul.u32.u64.high %v251_v56, %v246_v57, %v773_v60  ;;  %v778_v0 = vmul.u32.u64.low %v251_v56, %v250_v58  ;;  %v779_v1 = vmul.u32.u64.high %v251_v56, %v250_v58, %v778_v0 }
  0xb5   : > { %v242_v5 = vsel %vm236_vm8, %v239_v3, %v241_v4 }
  0xb6   : > { %v261_v7 = vadd.s32 1, %v774_v61  ;;  %vm260_vm9 = vc.u32 %v779_v1, %v773_v60  ;;  %v258_v9 = vmul.u32 %v251_v56, %v242_v5  ;;  %v259_v23 = vadd.s32 %v773_v60, %v779_v1 }
  0xb8   : > { %v262_v10 = vsel %vm260_vm9, %v261_v7, %v774_v61 }
  0xb9   : > { %v263_v11 = vadd.s32 %v262_v10, %v258_v9 }
  0xbb   : > { %v264_v12 = vadd.s32 536870912, %v263_v11 }
  0xbd   : > { %v265_v13 = vshrl.u32 %v264_v12, 30 }
  0xbf   : > { %v266_v14 = vshll.u32 %v265_v13, 30  ;;  %v289_v38 = vsub.s32 4, %v265_v13 }
  0xc1   : > { %v267_v15 = vsub.s32 %v263_v11, %v266_v14  ;;  %v290_v39 = vsel %vm205_vm11, %v289_v38, %v265_v13 }
  0xc2   : > { %v292_v40 = vsel %vm204_vm12, 0, %v290_v39 }
  0xc3   : > { %v269_v16 = vsub.s32 0, %v267_v15  ;;  %v399_v41 = vadd.s32 3, %v292_v40  ;;  %v296_v44 = vand.u32 3, %v292_v40 }
  0xc5   : > { %v531_v18 = vmin.u32 %v269_v16, %v267_v15  ;;  %v400_v45 = vand.u32 3, %v399_v41  ;;  %vm298_vm13 = vcmp.eq.s32.totalorder %v296_v44, 0  ;;  %vm301_vm14 = vcmp.eq.s32.totalorder %v296_v44, 2 }
  0xc6   : > { %vm297_vm1 = vcmp.lt.s32.totalorder %v296_v44, 2 }
  0xc7   : > { %v271_v19 = vclz %v531_v18  ;;  %vm402_vm15 = vcmp.eq.s32.totalorder %v400_v45, 0  ;;  %vm405_vm0 = vcmp.eq.s32.totalorder %v400_v45, 2  ;;  %vm401_vm2 = vcmp.lt.s32.totalorder %v400_v45, 2 }
  0xc9   : > { %v532_v20 = vadd.s32 4294967294, %v271_v19 }
  0xcb   : > { %vm533_vm10 = vcmp.lt.s32.totalorder %v532_v20, 0 }
  0xcc   : > { %v274_v21 = vsel %vm533_vm10, 0, %v532_v20 }
  0xcd   : > { %v279_v22 = vsub.s32 4294967266, %v274_v21  ;;  %v275_v24 = vsub.s32 32, %v274_v21  ;;  %v276_v26 = vshll.u32 %v267_v15, %v274_v21 }
  0xcf   : > { %v280_v25 = vadd.s32 127, %v279_v22  ;;  %v277_v27 = vshrl.u32 %v259_v23, %v275_v24 }
  0xd1   : > { %v281_v28 = vshll.u32 %v280_v25, 23  ;;  %v278_v30 = vor.u32 %v277_v27, %v276_v26 }
  0xd3   : > { %v282_v31 = vor.u32 4788187, %v281_v28  ;;  %v285_v33 = vcvt.s32.f32 %v278_v30 }
  0xd5   : > { %v283_v32 = vand.u32 2147483647, %v282_v31 }
  0xd7   : > { %v286_v34 = vmul.f32 %v285_v33, %v283_v32 }
  0xd9   : > { %v287_v35 = vxor.u32 2147483648, %v286_v34 }
  0xdb   : > { %v288_v36 = vsel %vm205_vm11, %v287_v35, %v286_v34 }
  0xdc   : > { %v291_v37 = vsel %vm204_vm12, %v759_v17, %v288_v36 }
  0xdd   : > { %596 = vcosq.f32 %v291_v37 }
  0xde   : > { %598 = vsinq.f32 %v291_v37 }
  0xea   : > { %v597_v42 = vpop.eup %596 }
  0xeb   : > { %v599_v43 = vpop.eup %598  ;;  %v302_v47 = vxor.u32 2147483648, %v597_v42 }
  0xec   : > { %v299_v46 = vxor.u32 2147483648, %v599_v43 }
  0xed   : > { %v303_v48 = vsel %vm301_vm14, %v302_v47, %v599_v43  ;;  %v407_v50 = vsel %vm405_vm0, %v302_v47, %v599_v43 }
  0xee   : > { %v300_v29 = vsel %vm298_vm13, %v597_v42, %v299_v46  ;;  %v404_v49 = vsel %vm402_vm15, %v597_v42, %v299_v46 }
  0xef   : > { %v304_v52 = vsel %vm297_vm1, %v300_v29, %v303_v48  ;;  %v408_v53 = vsel %vm401_vm2, %v404_v49, %v407_v50 }
  0xfe   : > { %v417_v59 = vpop.permute.xlu1 %416 }
  0xff   : > { %v418_v62 = vsel %vm412_vm3, %v417_v59, %v752_v6  ;;  %vm295_vm3 = vweird.f32 %v759_v17 }
 0x100   : > { %426 = vrot.lane.b32.xlu1 %v418_v62, %s670_s8  ;;  %v305_v54 = vsel %vm295_vm3, nan, %v304_v52  ;;  %v409_v56 = vsel %vm295_vm3, nan, %v408_v53 }
 0x101   : > { %v433_v58 = vmul.f32 %v752_v6, %v305_v54 }
 0x104   : > { %429 = vrot.lane.b32.xlu1 %v418_v62, %s671_s9 }
 0x172   : > { %v427_v51 = vpop.permute.xlu1 %426 }
 0x176   : > { %v430_v55 = vpop.permute.xlu1 %429 }
 0x177   : > { %v432_v57 = vsel %vm424_vm4, %v427_v51, %v430_v55 }
 0x178   : > { %v434_v59 = vmul.f32 %v432_v57, %v409_v56 }
 0x17a   : > { %v435_v60 = vadd.f32 %v434_v59, %v433_v58 }
 0x17c   : > { %437 = vst.msk [vmem:[%s174_s19] sm:$0xff] %vm436_vm5, %v435_v60 }
 0x17d   : > { %613 = shalt.err (!%p610_p3)
}
 0x17e   : > { %s614_s4 = scalar_lea.hbm %s450_s26, 128  ;;  %s618_s7 = scalar_lea.hbm %s833_s3, 256 }
 0x17f   : > { %p615_p4 = scmp.ne.s32.totalorder %s450_s26, %s614_s4  ;;  %p619_p9 = scmp.lt.s32.totalorder %s450_s26, %s833_s3 }
 0x180   : > { %p620_p10 = scmp.lt.s32.totalorder %s618_s7, %s614_s4 }
 0x181   : > { %p616_p7 = pnand %p615_p4, %p731_p5 }
 0x182   : > { %p621_p11 = por %p620_p10, %p619_p9 }
 0x183   : > { %p617_p8 = pneg %p616_p7 }
 0x185   : > { %p622_p12 = pnand %p621_p11, %p617_p8 }
 0x187   : > { %625 = shalt.err (!%p622_p12)
}
 0x188   : > { %546 = dma.vmem_to_hbm [thread:$0]  (%p731_p5), %s453_s20, 128, %s450_s26, %s439_s27  }
 0x189 PF: > { %p552_p13 = scmp.ge.s32.totalorder %s660_s15, 2  ;;  %s464_s10 = sand.u32 1, %s648_s12  }
 0x18a   : > { %s465_s11 = scalar_lea.sflag [#allocation3], %s464_s10 }
 0x18b   : > { %p549_p0 = pnand %p552_p13, %p735_p6 }
 0x18d   : > { %p550_p1 = pneg %p549_p0 }
 0x18f   : > { %643 = dma.done.wait (%p550_p1), %s465_s11, 128  }
 0x190   : > { %645 = vsyncadd (%p550_p1), %s465_s11, 4294967168  ;;  %p13_p2 = scmp.ge.s32.totalorder %s718_s18, 4   ;;  %s836_s12 = smov %s652_s13 }
 0x191   : > { %s837_s13 = smov %s656_s14  ;;  %s838_s14 = smov %s729_s21 }
 0x192   : > { %s839_s15 = smov %s718_s18  ;;  %15 = sbr.rel (!%p13_p2) target bundleno = 3 (0x3), region = 70 }
 0x197   :  { %470 = vsyncpa [#allocation3], 1 }
 0x198   :  { %472 = vsyncpa [#allocation3 + $0x1], 1 }

</bundles_post_ra>
